<compile_context>
chip_gen: v7x
topology: tpu7x:2x2x1
jax: 0.10.0
libtpu: 0.0.40
codegen_flags: <defaults>
</compile_context>

<pallas_src>
import functools

import jax
import jax.numpy as jnp
from jax import lax
from jax.experimental import pallas as pl
from jax.experimental.pallas import tpu as pltpu

LANE = 128
SUBLANE = 8
_MIB = 1024 * 1024
# Minimum grid steps for non-tiny arrays: 2 steps per v7x TensorCore keeps
# each core's fetch/compute/writeback pipeline double-buffered.
_MIN_GRID_STEPS = 4
# Arrays with at most this many rows are done as one full-extent block.
_TINY_ROWS = 4 * SUBLANE


def _pipeline_vmem_budget_bytes() -> int:
    """Total VMEM budget for all pipelined in/out tile buffers, per chip gen."""
    try:
        kind = jax.devices()[0].device_kind.lower()
    except Exception:  # no devices / unusual backend: stay conservative
        kind = ""
    if ("v6" in kind) or ("v7" in kind) or ("7x" in kind):
        # 32 MiB scoped-VMEM default on v6e/v7x; 24 MiB of pipelined tiles
        # leaves headroom and stays far below v7x's 64 MiB physical VMEM/TC.
        return 24 * _MIB
    # v5e (16 MiB scoped default) and unknown chips.
    return 12 * _MIB


def _choose_tiling(rows: int, dtype_bytes: int, num_pipeline_bufs: int):
    """Pick (tile_rows, grid_len) for a (rows, 128) slab."""
    if rows <= _TINY_ROWS:
        # One full-extent block (satisfies the (8,128) rule by equalling the
        # full array dims); per-step overhead dominates anyway at this size.
        return rows, 1

    budget = _pipeline_vmem_budget_bytes()
    row_bytes = LANE * dtype_bytes
    # Largest tile (in rows) such that all pipelined buffers fit the budget.
    max_tile_rows = (budget // num_pipeline_bufs) // row_bytes
    max_tile_rows = max(SUBLANE, (max_tile_rows // SUBLANE) * SUBLANE)

    # Steps implied by the byte target, then enforce the megacore minimum and
    # an even step count so the two v7x TensorCores get balanced halves.
    steps = pl.cdiv(rows, max_tile_rows)
    steps = max(steps, min(_MIN_GRID_STEPS, rows // SUBLANE))
    if steps > 1 and steps % 2:
        steps += 1

    tile_rows = pl.cdiv(pl.cdiv(rows, steps), SUBLANE) * SUBLANE
    tile_rows = min(tile_rows, max_tile_rows)
    grid_len = pl.cdiv(rows, tile_rows)
    return tile_rows, grid_len


def _leaky_pflu_kernel(x_ref, o_ref, *, a, b):
    # Always compute in f32 (free: kernel is HBM-bound); cast only on store.
    x = x_ref[...].astype(jnp.float32)
    # s = x / sqrt(x^2 + 1): rsqrt goes to the EUP (separate bundle slot).
    s = x * lax.rsqrt(x * x + 1.0)
    # Folded form of (1 - lamb) * PFLU(x) + lamb * x.
    o_ref[...] = (x * (a * s + b)).astype(o_ref.dtype)


def leaky_pflu(
    x: jax.Array,
    lamb: float = 0.01,
    *,
    donate: bool = False,
    input_buffer_count: int = 2,
) -> jax.Array:
    """Elementwise LeakyPFLU via a tiled Pallas TPU kernel. Any shape/dtype.

    donate: alias the output onto the input HBM buffer (caller must not reuse x).
    input_buffer_count: pipeline depth for the input tiles (sweep 3 only if a
      bandwidth measurement shows the kernel below ~85-90% of HBM roofline).
    """
    orig_shape = x.shape
    orig_dtype = x.dtype
    n = x.size

    # --- Lay the data out as a lane-dense (rows, 128) slab. ------------------
    if n % LANE == 0:
        # Zero-copy fast path: layout-preserving reshape, no pad, no tail slice.
        rows = n // LANE
        pad = 0
        x2d = x.reshape(rows, LANE)
    else:
        rows = pl.cdiv(n, LANE)
        pad = rows * LANE - n
        x2d = jnp.pad(x.reshape(-1), (0, pad)).reshape(rows, LANE)

    # --- Tile selection (byte-target + megacore balance). --------------------
    dtype_bytes = jnp.dtype(orig_dtype).itemsize
    num_pipeline_bufs = input_buffer_count + 2  # N-deep input + 2-deep output
    tile_rows, grid_len = _choose_tiling(rows, dtype_bytes, num_pipeline_bufs)

    kernel = functools.partial(
        _leaky_pflu_kernel,
        a=float((1.0 - lamb) * 0.5),
        b=float((1.0 + lamb) * 0.5),
    )

    in_spec_kwargs = {}
    if input_buffer_count != 2:
        in_spec_kwargs["pipeline_mode"] = pl.Buffered(input_buffer_count)
    in_spec = pl.BlockSpec((tile_rows, LANE), lambda i: (i, 0), **in_spec_kwargs)
    out_spec = pl.BlockSpec((tile_rows, LANE), lambda i: (i, 0))

    n_slab = rows * LANE
    y2d = pl.pallas_call(
        kernel,
        out_shape=jax.ShapeDtypeStruct((rows, LANE), orig_dtype),
        grid_spec=pltpu.PrefetchScalarGridSpec(
            num_scalar_prefetch=0,
            grid=(grid_len,),
            in_specs=[in_spec],
            out_specs=out_spec,
        ),
        compiler_params=pltpu.CompilerParams(
            dimension_semantics=("parallel",)),
        cost_estimate=pl.CostEstimate(
            flops=6 * n_slab,
            transcendentals=n_slab,
            bytes_accessed=2 * n_slab * dtype_bytes,
        ),
        input_output_aliases=({0: 0} if donate else {}),
    )(x2d)

    if pad == 0:
        return y2d.reshape(orig_shape)
    return y2d.reshape(-1)[:n].reshape(orig_shape)


def leaky_pflu_ref(x, lamb=0.01):
    xf = x.astype(jnp.float32)
    s = xf * lax.rsqrt(xf * xf + 1.0)
    pflu = xf * (1.0 + s) * 0.5
    return ((1.0 - lamb) * pflu + lamb * xf).astype(x.dtype)


if __name__ == "__main__":
    key = jax.random.PRNGKey(0)

    # NCHW input matching a typical conv feature map (aligned fast path).
    x = jax.random.normal(key, (2, 4, 16, 16), dtype=jnp.float32)
    y = leaky_pflu(x, lamb=0.01)
    jax.block_until_ready(y)
    y_ref = leaky_pflu_ref(x, lamb=0.01)
    assert y.shape == x.shape and y.dtype == x.dtype
    assert jnp.allclose(y, y_ref, atol=1e-6, rtol=1e-5)

    # Ragged size (exercises the pad + tail-slice fallback path).
    xr = jax.random.normal(jax.random.PRNGKey(1), (3, 5, 7, 11), dtype=jnp.float32)
    yr = leaky_pflu(xr, lamb=0.01)
    jax.block_until_ready(yr)
    assert yr.shape == xr.shape
    assert jnp.allclose(yr, leaky_pflu_ref(xr, lamb=0.01), atol=1e-6, rtol=1e-5)

    # bf16 input: compute happens in f32 in-kernel, only the store is bf16.
    xb = jax.random.normal(jax.random.PRNGKey(2), (2, 4, 16, 16), dtype=jnp.bfloat16)
    yb = leaky_pflu(xb, lamb=0.01)
    jax.block_until_ready(yb)
    assert yb.shape == xb.shape and yb.dtype == xb.dtype
    assert jnp.allclose(yb.astype(jnp.float32),
                        leaky_pflu_ref(xb, lamb=0.01).astype(jnp.float32),
                        atol=1e-2, rtol=1e-2)

    # Larger aligned shape exercising the multi-step (balanced, even) grid.
    xl = jax.random.normal(jax.random.PRNGKey(3), (8, 16, 32, 32), dtype=jnp.float32)
    yl = leaky_pflu(xl, lamb=0.01)
    jax.block_until_ready(yl)
    assert jnp.allclose(yl, leaky_pflu_ref(xl, lamb=0.01), atol=1e-6, rtol=1e-5)

    print("KERNEL_OK")
</pallas_src>

<mosaic_0001>
module attributes {stable_mosaic.version = 11 : i64} {
  func.func @_leaky_pflu_kernel(%arg0: i32, %arg1: memref<16x128xf32, #tpu.memory_space<vmem>>, %arg2: memref<16x128xf32, #tpu.memory_space<vmem>>) attributes {dimension_semantics = [#tpu.dimension_semantics<parallel>], iteration_bounds = array<i64: 1>, scalar_prefetch = 0 : i64, scratch_operands = 0 : i64, tpu.core_type = #tpu.core_type<tc>, window_params = [{transform_indices = @transform_0, window_bounds = array<i64: 16, 128>}, {transform_indices = @transform_1, window_bounds = array<i64: 16, 128>}]} {
    %c0 = arith.constant 0 : index
    %c0_0 = arith.constant 0 : index
    %0 = vector.load %arg1[%c0, %c0_0] : memref<16x128xf32, #tpu.memory_space<vmem>>, vector<16x128xf32>
    %1 = arith.mulf %0, %0 : vector<16x128xf32>
    %cst = arith.constant 1.000000e+00 : f32
    %2 = vector.broadcast %cst : f32 to vector<16x128xf32>
    %3 = arith.addf %1, %2 : vector<16x128xf32>
    %4 = math.rsqrt %3 : vector<16x128xf32>
    %5 = arith.mulf %0, %4 : vector<16x128xf32>
    %cst_1 = arith.constant 4.950000e-01 : f32
    %6 = vector.broadcast %cst_1 : f32 to vector<16x128xf32>
    %7 = arith.mulf %6, %5 : vector<16x128xf32>
    %cst_2 = arith.constant 5.050000e-01 : f32
    %8 = vector.broadcast %cst_2 : f32 to vector<16x128xf32>
    %9 = arith.addf %7, %8 : vector<16x128xf32>
    %10 = arith.mulf %0, %9 : vector<16x128xf32>
    %c0_3 = arith.constant 0 : index
    %c0_4 = arith.constant 0 : index
    %11 = vector.load %arg2[%c0_3, %c0_4] : memref<16x128xf32, #tpu.memory_space<vmem>>, vector<16x128xf32>
    tpu.vector_store %arg2[%c0_3, %c0_4], %10 {strides = array<i32>} : memref<16x128xf32, #tpu.memory_space<vmem>>, vector<16x128xf32>,
    return
  }
  func.func @transform_0(%arg0: i32) -> (i32, i32) {
    %c0_i32 = arith.constant 0 : i32
    %c0_i32_0 = arith.constant 0 : i32
    return %arg0, %c0_i32 : i32, i32
  }
  func.func @transform_1(%arg0: i32) -> (i32, i32) {
    %c0_i32 = arith.constant 0 : i32
    %c0_i32_0 = arith.constant 0 : i32
    return %arg0, %c0_i32 : i32, i32
  }
}

</mosaic_0001>

<bundles_post_ra>
// kernel: tpu_custom_call.1
= control target key start
LH: loop header
LB: loop body
LE: loop exit
PB: predicated region body
PF: predicated region fallthrough
CT: control target
= control target key end

     0   :  { %6 = vsyncpa [#allocation3], 0  ;;  %s158_s0 = inlined_call_operand.hbm [shape: f32[16,128], index: 0, kind: input, shape index: {}]   ;;  %s159_s1 = inlined_call_operand.hbm [shape: f32[16,128], index: 1, kind: output, shape index: {}]  }
   0x1   :  { %7 = vsyncpa [#allocation4], 0  ;;  %s114_s6 = smov [#allocation2]   ;;  %s66_s10 = scalar_lea.hbm %s158_s0, 256 }
   0x2   :  { %s13_s7 = sshll.u32 %s114_s6, 4  ;;  %p67_p0 = scmp.ne.s32.totalorder %s158_s0, %s66_s10  ;;  %s14_s7 = int_to_ptr.vmem [resolvable:$true] %s13_s7 }
   0x3   :  { %p70_p1 = scmp.lt.u32.totalorder %s66_s10, %s158_s0 }
   0x5   :  { %p72_p2 = pnand %p70_p1, %p67_p0 }
   0x7   :  { %75 = shalt.err (!%p72_p2)
}
   0x8   :  { %s76_s15 = scalar_lea.vmem %s14_s7, 256  ;;  %p81_p4 = scmp.lt.s32.totalorder %s14_s7, %s14_s7 }
   0x9   :  { %p77_p3 = scmp.ne.s32.totalorder %s14_s7, %s76_s15  ;;  %p82_p5 = scmp.lt.s32.totalorder %s76_s15, %s76_s15 }
   0xb   :  { %p83_p6 = por %p82_p5, %p81_p4 }
   0xd   :  { %p84_p7 = pnand %p83_p6, %p77_p3 }
   0xf   :  { %87 = shalt.err (!%p84_p7)
}
  0x10   :  { %s115_s16 = smov 128   ;;  %s116_s17 = smov 8  }
  0x11   :  { %19 = dma.hbm_to_vmem [thread:$0]  %s158_s0, 256, %s14_s7, [#allocation3], %s115_s16, %s115_s16, %s116_s17  }
  0x12   :  { %110 = dma.done.wait [#allocation3], 256  }
  0x13   :  { %111 = vsyncadd [#allocation3], 4294967040  ;;  %v23_v0 = vld [vmem:[#allocation2] sm:$0xff]  ;;  %v24_v1 = vld [vmem:[#allocation2 + $0x8] sm:$0xff]  ;;  %s117_s20 = smov [#allocation5]  }
  0x14   :  { %v25_v2 = vmul.f32 %v23_v0, %v23_v0  ;;  %v26_v3 = vmul.f32 %v24_v1, %v24_v1  ;;  %s46_s21 = sshll.u32 %s117_s20, 4  ;;  %s47_s21 = int_to_ptr.vmem [resolvable:$true] %s46_s21 }
  0x15   :  { %s88_s0 = scalar_lea.vmem %s47_s21, 256  ;;  %p93_p9 = scmp.lt.s32.totalorder %s47_s21, %s47_s21 }
  0x16   :  { %v27_v4 = vadd.f32 1.0, %v25_v2  ;;  %v28_v5 = vadd.f32 1.0, %v26_v3  ;;  %p89_p8 = scmp.ne.s32.totalorder %s47_s21, %s88_s0  ;;  %p94_p10 = scmp.lt.s32.totalorder %s88_s0, %s88_s0 }
  0x18   :  { %62 = vrsqrt.f32 %v27_v4  ;;  %p95_p11 = por %p94_p10, %p93_p9 }
  0x19   :  { %64 = vrsqrt.f32 %v28_v5 }
  0x1a   :  { %p96_p12 = pnand %p95_p11, %p89_p8 }
  0x22   :  { %v63_v6 = vpop.eup %62 }
  0x23   :  { %v65_v7 = vpop.eup %64  ;;  %v31_v8 = vmul.f32 %v63_v6, %v23_v0 }
  0x24   :  { %v32_v9 = vmul.f32 %v65_v7, %v24_v1 }
  0x25   :  { %v33_v10 = vmul.f32 0.495, %v31_v8 }
  0x26   :  { %v34_v11 = vmul.f32 0.495, %v32_v9 }
  0x27   :  { %v35_v12 = vadd.f32 0.505, %v33_v10 }
  0x28   :  { %v36_v13 = vadd.f32 0.505, %v34_v11 }
  0x29   :  { %v37_v14 = vmul.f32 %v35_v12, %v23_v0 }
  0x2a   :  { %v38_v15 = vmul.f32 %v36_v13, %v24_v1 }
  0x2b   :  { %39 = vst [vmem:[#allocation5] sm:$0xff] %v37_v14 }
  0x2c   :  { %40 = vst [vmem:[#allocation5 + $0x8] sm:$0xff] %v38_v15 }
  0x2d   :  { %99 = shalt.err (!%p96_p12)
}
  0x2e   :  { %s100_s24 = scalar_lea.hbm %s159_s1, 256 }
  0x2f   :  { %p101_p13 = scmp.ne.s32.totalorder %s159_s1, %s100_s24  ;;  %p104_p0 = scmp.lt.u32.totalorder %s100_s24, %s159_s1 }
  0x31   :  { %p106_p1 = pnand %p104_p0, %p101_p13 }
  0x33   :  { %109 = shalt.err (!%p106_p1)
}
  0x34   :  { %52 = dma.vmem_to_hbm [thread:$0]  %s47_s21, 256, %s159_s1, [#allocation4], %s115_s16, %s115_s16, %s116_s17  }
  0x35   :  { %112 = dma.done.wait [#allocation4], 256  }
  0x36   :  { %113 = vsyncadd [#allocation4], 4294967040 }
  0x37   :  { %56 = vsyncpa [#allocation3], 1 }
  0x38   :  { %57 = vsyncpa [#allocation4], 1 }

</bundles_post_ra>
